<compile_context>
chip_gen: v7x
topology: tpu7x:2x2x1
jax: 0.10.0
libtpu: 0.0.40
codegen_flags: <defaults>
</compile_context>

<pallas_src>
import jax
import jax.numpy as jnp
from jax.experimental import pallas as pl
from jax.experimental.pallas import tpu as pltpu

HIDDEN = 256
TWO_H = 2 * HIDDEN  # both heads fused along the lane / N axis


def _cdiv(a, b):
    return -(-a // b)


def _round_up(a, b):
    return _cdiv(a, b) * b


def _critic_kernel(s_ref, a_ref, w1s_ref, w1a_ref, w2_ref, w3_ref, b_ref, out_ref):
    # s:(tb, sd) bf16, a:(tb, ad) bf16
    # w1s:(sd, 512) bf16, w1a:(ad, 512) bf16  -- cols [0:256]=q1 head, [256:512]=q2 head
    # w2:(2, 256, 256) bf16                   -- per-head hidden layer
    # w3:(512, 2) bf16                        -- block-diagonal final projection
    # b:(3, 512) f32                          -- rows: b1 | b2 | [b3_q1, b3_q2, 0...]
    # out:(tb, 2) f32                         -- lane-slim q output (no padded columns)
    b = b_ref[...]
    b1 = b[0:1, :]
    b2 = b[1:2, :]
    b3 = b[2:3, 0:2]

    # Layer 1: both heads in one N=512 pass (K split over state / action).
    h = (jnp.dot(s_ref[...], w1s_ref[...], preferred_element_type=jnp.float32)
         + jnp.dot(a_ref[...], w1a_ref[...], preferred_element_type=jnp.float32)
         + b1)
    h = jnp.maximum(h, 0.0).astype(jnp.bfloat16)            # (tb, 512)

    # Layer 2: per-head 256x256 matmuls on vreg-aligned lane slices.
    h1 = jnp.dot(h[:, 0:HIDDEN], w2_ref[0], preferred_element_type=jnp.float32)
    h2 = jnp.dot(h[:, HIDDEN:TWO_H], w2_ref[1], preferred_element_type=jnp.float32)
    g = jnp.concatenate([h1, h2], axis=-1) + b2              # (tb, 512)
    g = jnp.maximum(g, 0.0).astype(jnp.bfloat16)

    # Layer 3: block-diagonal (512, 2) projection -> q1 in col 0, q2 in col 1.
    out_ref[...] = jnp.dot(g, w3_ref[...], preferred_element_type=jnp.float32) + b3


def critic_forward(state, action, packed, *, batch_tile=512):
    """Returns (q1, q2), each (batch, 1) float32, like Critic.forward."""
    state = state.astype(jnp.bfloat16)
    action = action.astype(jnp.bfloat16)
    batch, sd = state.shape
    ad = action.shape[1]

    bp8 = _round_up(batch, 8)
    tb = min(batch_tile, bp8)
    # For moderate/large batches keep >=2 batch tiles so the parallel batch axis
    # can be sharded across both v7x TensorCores.
    if bp8 >= 256 and _cdiv(bp8, tb) < 2:
        tb = _round_up(_cdiv(bp8, 2), 8)
    nb = _cdiv(bp8, tb)
    bp = nb * tb
    if bp != batch:
        state = jnp.pad(state, ((0, bp - batch), (0, 0)))
        action = jnp.pad(action, ((0, bp - batch), (0, 0)))

    w1s, w1a, w2, w3, b = (packed["w1s"], packed["w1a"], packed["w2"],
                           packed["w3"], packed["b"])

    grid_spec = pltpu.PrefetchScalarGridSpec(
        num_scalar_prefetch=0,
        grid=(nb,),
        in_specs=[
            pl.BlockSpec((tb, sd), lambda i: (i, 0)),
            pl.BlockSpec((tb, ad), lambda i: (i, 0)),
            # Weight blocks use constant index maps -> fetched once, kept resident.
            pl.BlockSpec((sd, TWO_H), lambda i: (0, 0)),
            pl.BlockSpec((ad, TWO_H), lambda i: (0, 0)),
            pl.BlockSpec((2, HIDDEN, HIDDEN), lambda i: (0, 0, 0)),
            pl.BlockSpec((TWO_H, 2), lambda i: (0, 0)),
            pl.BlockSpec((3, TWO_H), lambda i: (0, 0)),
        ],
        out_specs=pl.BlockSpec((tb, 2), lambda i: (i, 0)),
    )

    flops = 2 * bp * ((sd + ad) * TWO_H + 2 * HIDDEN * HIDDEN + TWO_H * 2)
    bytes_accessed = (
        bp * (sd + ad) * 2                 # bf16 activations, read once
        + (sd + ad) * TWO_H * 2            # w1 (bf16)
        + 2 * HIDDEN * HIDDEN * 2          # w2 (bf16)
        + TWO_H * 2 * 2                    # w3 (bf16)
        + 3 * TWO_H * 4                    # biases (f32)
        + bp * 2 * 4)                      # slim q output (f32)

    out = pl.pallas_call(
        _critic_kernel,
        out_shape=jax.ShapeDtypeStruct((bp, 2), jnp.float32),
        grid_spec=grid_spec,
        compiler_params=pltpu.CompilerParams(
            dimension_semantics=("parallel",)),
        cost_estimate=pl.CostEstimate(
            flops=flops, transcendentals=0, bytes_accessed=bytes_accessed),
    )(state, action, w1s, w1a, w2, w3, b)

    q1 = out[:batch, 0:1]
    q2 = out[:batch, 1:2]
    return q1, q2


def init_critic_params(key, state_dim, action_dim):
    """f32 params mimicking PyTorch Linear init. Layout: weight (in, out), bias (out,)."""
    in_dim = state_dim + action_dim
    dims = [(in_dim, HIDDEN), (HIDDEN, HIDDEN), (HIDDEN, 1)]
    heads = []
    for _ in range(2):  # q1_net, q2_net
        layers = []
        for fan_in, fan_out in dims:
            key, kw, kb = jax.random.split(key, 3)
            bound = float(fan_in) ** -0.5
            w = jax.random.uniform(kw, (fan_in, fan_out), jnp.float32,
                                   minval=-bound, maxval=bound)
            bvec = jax.random.uniform(kb, (fan_out,), jnp.float32,
                                      minval=-bound, maxval=bound)
            layers.append((w, bvec))
        heads.append(layers)
    return heads


def pack_critic_params(raw_params, state_dim):
    """Pack per-head params into 5 fused, kernel-friendly arrays."""
    (w1_1, b1_1), (w2_1, b2_1), (w3_1, b3_1) = raw_params[0]
    (w1_2, b1_2), (w2_2, b2_2), (w3_2, b3_2) = raw_params[1]

    w1_all = jnp.concatenate([w1_1, w1_2], axis=1)            # (sd+ad, 512)
    w1s = w1_all[:state_dim]                                   # (sd, 512)
    w1a = w1_all[state_dim:]                                   # (ad, 512)
    w2 = jnp.stack([w2_1, w2_2])                               # (2, 256, 256)

    # Block-diagonal final projection: q1 -> column 0, q2 -> column 1.
    w3 = jnp.zeros((TWO_H, 2), jnp.float32)
    w3 = w3.at[:HIDDEN, 0].set(w3_1[:, 0]).at[HIDDEN:, 1].set(w3_2[:, 0])

    b = jnp.stack([
        jnp.concatenate([b1_1, b1_2]),
        jnp.concatenate([b2_1, b2_2]),
        jnp.concatenate([b3_1, b3_2, jnp.zeros(TWO_H - 2, jnp.float32)]),
    ])                                                          # (3, 512)

    return dict(
        w1s=w1s.astype(jnp.bfloat16),
        w1a=w1a.astype(jnp.bfloat16),
        w2=w2.astype(jnp.bfloat16),
        w3=w3.astype(jnp.bfloat16),
        b=b.astype(jnp.float32),
    )


def _reference_exact(state, action, raw_params):
    """Exact f32 reference matching PyTorch Critic.forward semantics."""
    x = jnp.concatenate([state, action], axis=1).astype(jnp.float32)
    outs = []
    for (w1, b1), (w2, b2), (w3, b3) in raw_params:
        h = jnp.maximum(x @ w1 + b1, 0.0)
        h = jnp.maximum(h @ w2 + b2, 0.0)
        outs.append(h @ w3 + b3)
    return outs[0], outs[1]


def _reference_bf16(state, action, packed):
    """Reference emulating the kernel's bf16-operand / f32-accumulate math."""
    s = state.astype(jnp.bfloat16).astype(jnp.float32)
    a = action.astype(jnp.bfloat16).astype(jnp.float32)
    w1s = packed["w1s"].astype(jnp.float32)
    w1a = packed["w1a"].astype(jnp.float32)
    w2 = packed["w2"].astype(jnp.float32)
    w3 = packed["w3"].astype(jnp.float32)
    b = packed["b"]

    h = jnp.maximum(s @ w1s + a @ w1a + b[0], 0.0)
    h = h.astype(jnp.bfloat16).astype(jnp.float32)
    h1 = h[:, :HIDDEN] @ w2[0]
    h2 = h[:, HIDDEN:] @ w2[1]
    g = jnp.maximum(jnp.concatenate([h1, h2], axis=1) + b[1], 0.0)
    g = g.astype(jnp.bfloat16).astype(jnp.float32)
    q = g @ w3 + b[2, :2]
    return q[:, 0:1], q[:, 1:2]


if __name__ == "__main__":
    key = jax.random.PRNGKey(0)
    batch, state_dim, action_dim = 8, 16, 4

    kp, ks, ka = jax.random.split(key, 3)
    raw_params = init_critic_params(kp, state_dim, action_dim)
    packed = pack_critic_params(raw_params, state_dim)

    state = jax.random.normal(ks, (batch, state_dim), jnp.float32)
    action = jax.random.normal(ka, (batch, action_dim), jnp.float32)

    q1, q2 = jax.jit(critic_forward)(state, action, packed)
    jax.block_until_ready((q1, q2))

    assert q1.shape == (batch, 1) and q2.shape == (batch, 1)

    # Tight check against a reference using the same bf16-operand arithmetic.
    rb1, rb2 = _reference_bf16(state, action, packed)
    assert jnp.allclose(q1, rb1, atol=2e-3, rtol=2e-3), float(jnp.max(jnp.abs(q1 - rb1)))
    assert jnp.allclose(q2, rb2, atol=2e-3, rtol=2e-3), float(jnp.max(jnp.abs(q2 - rb2)))

    # Sanity check against the exact f32 PyTorch-semantics reference
    # (looser tolerance because MXU operands are bf16).
    r1, r2 = _reference_exact(state, action, raw_params)
    assert jnp.allclose(q1, r1, atol=3e-2, rtol=3e-2), float(jnp.max(jnp.abs(q1 - r1)))
    assert jnp.allclose(q2, r2, atol=3e-2, rtol=3e-2), float(jnp.max(jnp.abs(q2 - r2)))

    print("KERNEL_OK")
</pallas_src>

<mosaic_0001>
module attributes {stable_mosaic.version = 11 : i64} {
  func.func @_critic_kernel(%arg0: i32, %arg1: memref<8x16xbf16, #tpu.memory_space<vmem>>, %arg2: memref<8x4xbf16, #tpu.memory_space<vmem>>, %arg3: memref<16x512xbf16, #tpu.memory_space<vmem>>, %arg4: memref<4x512xbf16, #tpu.memory_space<vmem>>, %arg5: memref<2x256x256xbf16, #tpu.memory_space<vmem>>, %arg6: memref<512x2xbf16, #tpu.memory_space<vmem>>, %arg7: memref<3x512xf32, #tpu.memory_space<vmem>>, %arg8: memref<8x2xf32, #tpu.memory_space<vmem>>) attributes {dimension_semantics = [#tpu.dimension_semantics<parallel>], iteration_bounds = array<i64: 1>, scalar_prefetch = 0 : i64, scratch_operands = 0 : i64, tpu.core_type = #tpu.core_type<tc>, window_params = [{transform_indices = @transform_0, window_bounds = array<i64: 8, 16>}, {transform_indices = @transform_1, window_bounds = array<i64: 8, 4>}, {pipeline_mode = #tpu.pipeline_mode<synchronous>, transform_indices = @transform_2, window_bounds = array<i64: 16, 512>}, {pipeline_mode = #tpu.pipeline_mode<synchronous>, transform_indices = @transform_3, window_bounds = array<i64: 4, 512>}, {pipeline_mode = #tpu.pipeline_mode<synchronous>, transform_indices = @transform_4, window_bounds = array<i64: 2, 256, 256>}, {pipeline_mode = #tpu.pipeline_mode<synchronous>, transform_indices = @transform_5, window_bounds = array<i64: 512, 2>}, {pipeline_mode = #tpu.pipeline_mode<synchronous>, transform_indices = @transform_6, window_bounds = array<i64: 3, 512>}, {transform_indices = @transform_7, window_bounds = array<i64: 8, 2>}]} {
    %c0 = arith.constant 0 : index
    %c0_0 = arith.constant 0 : index
    %0 = vector.load %arg7[%c0, %c0_0] : memref<3x512xf32, #tpu.memory_space<vmem>>, vector<3x512xf32>
    %1 = vector.extract_strided_slice %0 {offsets = [0, 0], sizes = [1, 512], strides = [1, 1]} : vector<3x512xf32> to vector<1x512xf32>
    %2 = vector.extract_strided_slice %0 {offsets = [1, 0], sizes = [1, 512], strides = [1, 1]} : vector<3x512xf32> to vector<1x512xf32>
    %3 = vector.extract_strided_slice %0 {offsets = [2, 0], sizes = [1, 2], strides = [1, 1]} : vector<3x512xf32> to vector<1x2xf32>
    %c0_1 = arith.constant 0 : index
    %c0_2 = arith.constant 0 : index
    %4 = vector.load %arg1[%c0_1, %c0_2] : memref<8x16xbf16, #tpu.memory_space<vmem>>, vector<8x16xbf16>
    %c0_3 = arith.constant 0 : index
    %c0_4 = arith.constant 0 : index
    %5 = vector.load %arg3[%c0_3, %c0_4] : memref<16x512xbf16, #tpu.memory_space<vmem>>, vector<16x512xbf16>
    %cst = arith.constant dense<0.000000e+00> : vector<8x512xf32>
    %6 = tpu.matmul %4, %5, %cst {dimension_numbers = #tpu.dot_dimension_numbers<[1], [0], [0], [1], [0, 0, 1, 1], [], []>} : vector<8x16xbf16>, vector<16x512xbf16>, vector<8x512xf32> -> vector<8x512xf32>
    %c0_5 = arith.constant 0 : index
    %c0_6 = arith.constant 0 : index
    %7 = vector.load %arg2[%c0_5, %c0_6] : memref<8x4xbf16, #tpu.memory_space<vmem>>, vector<8x4xbf16>
    %c0_7 = arith.constant 0 : index
    %c0_8 = arith.constant 0 : index
    %8 = vector.load %arg4[%c0_7, %c0_8] : memref<4x512xbf16, #tpu.memory_space<vmem>>, vector<4x512xbf16>
    %cst_9 = arith.constant dense<0.000000e+00> : vector<8x512xf32>
    %9 = tpu.matmul %7, %8, %cst_9 {dimension_numbers = #tpu.dot_dimension_numbers<[1], [0], [0], [1], [0, 0, 1, 1], [], []>} : vector<8x4xbf16>, vector<4x512xbf16>, vector<8x512xf32> -> vector<8x512xf32>
    %10 = arith.addf %6, %9 : vector<8x512xf32>
    %11 = vector.broadcast %1 : vector<1x512xf32> to vector<8x512xf32>
    %12 = arith.addf %10, %11 : vector<8x512xf32>
    %cst_10 = arith.constant 0.000000e+00 : f32
    %13 = vector.broadcast %cst_10 : f32 to vector<8x512xf32>
    %14 = arith.maximumf %12, %13 : vector<8x512xf32>
    %15 = arith.truncf %14 : vector<8x512xf32> to vector<8x512xbf16>
    %16 = vector.extract_strided_slice %15 {offsets = [0, 0], sizes = [8, 256], strides = [1, 1]} : vector<8x512xbf16> to vector<8x256xbf16>
    %c0_11 = arith.constant 0 : index
    %c0_12 = arith.constant 0 : index
    %c0_13 = arith.constant 0 : index
    %17 = vector.load %arg5[%c0_11, %c0_12, %c0_13] : memref<2x256x256xbf16, #tpu.memory_space<vmem>>, vector<1x256x256xbf16>
    %18 = vector.shape_cast %17 : vector<1x256x256xbf16> to vector<256x256xbf16>
    %cst_14 = arith.constant dense<0.000000e+00> : vector<8x256xf32>
    %19 = tpu.matmul %16, %18, %cst_14 {dimension_numbers = #tpu.dot_dimension_numbers<[1], [0], [0], [1], [0, 0, 1, 1], [], []>} : vector<8x256xbf16>, vector<256x256xbf16>, vector<8x256xf32> -> vector<8x256xf32>
    %20 = vector.extract_strided_slice %15 {offsets = [0, 256], sizes = [8, 256], strides = [1, 1]} : vector<8x512xbf16> to vector<8x256xbf16>
    %c1 = arith.constant 1 : index
    %c0_15 = arith.constant 0 : index
    %c0_16 = arith.constant 0 : index
    %21 = vector.load %arg5[%c1, %c0_15, %c0_16] : memref<2x256x256xbf16, #tpu.memory_space<vmem>>, vector<1x256x256xbf16>
    %22 = vector.shape_cast %21 : vector<1x256x256xbf16> to vector<256x256xbf16>
    %cst_17 = arith.constant dense<0.000000e+00> : vector<8x256xf32>
    %23 = tpu.matmul %20, %22, %cst_17 {dimension_numbers = #tpu.dot_dimension_numbers<[1], [0], [0], [1], [0, 0, 1, 1], [], []>} : vector<8x256xbf16>, vector<256x256xbf16>, vector<8x256xf32> -> vector<8x256xf32>
    %24 = tpu.concatenate %19, %23 in 1 : vector<8x256xf32>, vector<8x256xf32> -> vector<8x512xf32>
    %25 = vector.broadcast %2 : vector<1x512xf32> to vector<8x512xf32>
    %26 = arith.addf %24, %25 : vector<8x512xf32>
    %cst_18 = arith.constant 0.000000e+00 : f32
    %27 = vector.broadcast %cst_18 : f32 to vector<8x512xf32>
    %28 = arith.maximumf %26, %27 : vector<8x512xf32>
    %29 = arith.truncf %28 : vector<8x512xf32> to vector<8x512xbf16>
    %c0_19 = arith.constant 0 : index
    %c0_20 = arith.constant 0 : index
    %30 = vector.load %arg6[%c0_19, %c0_20] : memref<512x2xbf16, #tpu.memory_space<vmem>>, vector<512x2xbf16>
    %cst_21 = arith.constant dense<0.000000e+00> : vector<8x2xf32>
    %31 = tpu.matmul %29, %30, %cst_21 {dimension_numbers = #tpu.dot_dimension_numbers<[1], [0], [0], [1], [0, 0, 1, 1], [], []>} : vector<8x512xbf16>, vector<512x2xbf16>, vector<8x2xf32> -> vector<8x2xf32>
    %32 = vector.broadcast %3 : vector<1x2xf32> to vector<8x2xf32>
    %33 = arith.addf %31, %32 : vector<8x2xf32>
    %c0_22 = arith.constant 0 : index
    %c0_23 = arith.constant 0 : index
    %34 = vector.load %arg8[%c0_22, %c0_23] : memref<8x2xf32, #tpu.memory_space<vmem>>, vector<8x2xf32>
    tpu.vector_store %arg8[%c0_22, %c0_23], %33 {strides = array<i32>} : memref<8x2xf32, #tpu.memory_space<vmem>>, vector<8x2xf32>,
    return
  }
  func.func @transform_0(%arg0: i32) -> (i32, i32) {
    %c0_i32 = arith.constant 0 : i32
    %c0_i32_0 = arith.constant 0 : i32
    return %arg0, %c0_i32 : i32, i32
  }
  func.func @transform_1(%arg0: i32) -> (i32, i32) {
    %c0_i32 = arith.constant 0 : i32
    %c0_i32_0 = arith.constant 0 : i32
    return %arg0, %c0_i32 : i32, i32
  }
  func.func @transform_2(%arg0: i32) -> (i32, i32) {
    %c0_i32 = arith.constant 0 : i32
    %c0_i32_0 = arith.constant 0 : i32
    %c0_i32_1 = arith.constant 0 : i32
    return %c0_i32, %c0_i32_0 : i32, i32
  }
  func.func @transform_3(%arg0: i32) -> (i32, i32) {
    %c0_i32 = arith.constant 0 : i32
    %c0_i32_0 = arith.constant 0 : i32
    %c0_i32_1 = arith.constant 0 : i32
    return %c0_i32, %c0_i32_0 : i32, i32
  }
  func.func @transform_4(%arg0: i32) -> (i32, i32, i32) {
    %c0_i32 = arith.constant 0 : i32
    %c0_i32_0 = arith.constant 0 : i32
    %c0_i32_1 = arith.constant 0 : i32
    %c0_i32_2 = arith.constant 0 : i32
    return %c0_i32, %c0_i32_0, %c0_i32_1 : i32, i32, i32
  }
  func.func @transform_5(%arg0: i32) -> (i32, i32) {
    %c0_i32 = arith.constant 0 : i32
    %c0_i32_0 = arith.constant 0 : i32
    %c0_i32_1 = arith.constant 0 : i32
    return %c0_i32, %c0_i32_0 : i32, i32
  }
  func.func @transform_6(%arg0: i32) -> (i32, i32) {
    %c0_i32 = arith.constant 0 : i32
    %c0_i32_0 = arith.constant 0 : i32
    %c0_i32_1 = arith.constant 0 : i32
    return %c0_i32, %c0_i32_0 : i32, i32
  }
  func.func @transform_7(%arg0: i32) -> (i32, i32) {
    %c0_i32 = arith.constant 0 : i32
    %c0_i32_0 = arith.constant 0 : i32
    return %arg0, %c0_i32 : i32, i32
  }
}

</mosaic_0001>

<bundles_post_ra>
// kernel: critic_forward.1
= control target key start
LH: loop header
LB: loop body
LE: loop exit
PB: predicated region body
PF: predicated region fallthrough
CT: control target
= control target key end

     0   :  { %12 = vsyncpa [#allocation3], 0  ;;  %s1499_s24 = smov [#allocation2]   ;;  %s1703_s0 = inlined_call_operand.vmem [shape: bf16[8,16], index: 0, kind: input, shape index: {}]   ;;  %s1704_s1 = inlined_call_operand.vmem [shape: bf16[8,4], index: 1, kind: input, shape index: {}]   ;;  %s1705_s2 = inlined_call_operand.vmem [shape: bf16[16,512], index: 2, kind: input, shape index: {}]   ;;  %s1706_s3 = inlined_call_operand.vmem [shape: bf16[4,512], index: 3, kind: input, shape index: {}]   ;;  %s1707_s4 = inlined_call_operand.hbm [shape: bf16[2,256,256], index: 4, kind: input, shape index: {}]   ;;  %s1708_s5 = inlined_call_operand.vmem [shape: bf16[512,2], index: 5, kind: input, shape index: {}]   ;;  %s1709_s6 = inlined_call_operand.vmem [shape: f32[3,512], index: 6, kind: input, shape index: {}]   ;;  %s1710_s7 = inlined_call_operand.vmem [shape: f32[8,2], index: 7, kind: output, shape index: {}]  }
   0x1   :  { %s26_s25 = sshll.u32 %s1499_s24, 4  ;;  %s1475_s28 = scalar_lea.hbm %s1707_s4, 8192  ;;  %s27_s25 = int_to_ptr.vmem [resolvable:$true] %s26_s25 }
   0x2   :  { %p1476_p0 = scmp.ne.s32.totalorder %s1707_s4, %s1475_s28  ;;  %p1479_p1 = scmp.lt.u32.totalorder %s1475_s28, %s1707_s4 }
   0x4   :  { %p1481_p2 = pnand %p1479_p1, %p1476_p0 }
   0x6   :  { %1484 = shalt.err (!%p1481_p2)
}
   0x7   :  { %s1485_s10 = scalar_lea.vmem %s27_s25, 8192  ;;  %p1490_p4 = scmp.lt.s32.totalorder %s27_s25, %s27_s25 }
   0x8   :  { %p1486_p3 = scmp.ne.s32.totalorder %s27_s25, %s1485_s10  ;;  %p1491_p5 = scmp.lt.s32.totalorder %s1485_s10, %s1485_s10 }
   0xa   :  { %p1492_p6 = por %p1491_p5, %p1490_p4 }
   0xc   :  { %p1493_p7 = pnand %p1492_p6, %p1486_p3 }
   0xe   :  { %1496 = shalt.err (!%p1493_p7)
}
   0xf   :  { %s1500_s11 = smov 128   ;;  %s1501_s12 = smov 8  }
  0x10   :  { %32 = dma.hbm_to_vmem [thread:$0]  %s1707_s4, 8192, %s27_s25, [#allocation3], %s1500_s11, %s1500_s11, %s1501_s12  }
  0x11   :  { %1497 = dma.done.wait [#allocation3], 8192  }
  0x12   :  { %1498 = vsyncadd [#allocation3], 4294959104  ;;  %v55_v0 = vlaneseq  ;;  %v1502_v1 = vmov 1983009808   ;;  %v1503_v3 = vmov 0   ;;  %v49_v7 = vld [vmem:[%s1706_s3] sm:$0xff] }
  0x13   :  { %v53_v2 = vunpack.c.l.s4 %v1502_v1  ;;  %117 = vmatprep.mubr.bf16.mxu0 %v1503_v3  ;;  %158 = vmatprep.mubr.bf16.mxu1 %v1503_v3  ;;  %vm72_vm0 = vcmask 1041408   ;;  %v51_v9 = vcombine.high %v49_v7, %v49_v7  ;;  %v1343_v13 = vld [vmem:[%s1705_s2 + $0x4] ss:$16 sps:$4 sm:$0xff]   ;;  %v48_v14 = vld [vmem:[%s1704_s1] sm:$0xf]  ;;  %vm68_vm1 = vcmask 31744  }
  0x14   :  { %v1556_v4 = vshrl.u32 %v55_v0, 7  ;;  %v1346_v17 = vld [vmem:[%s1705_s2 + $0xc] ss:$16 sps:$4 sm:$0xff]   ;;  %v1341_v18 = vld [vmem:[%s1705_s2] ss:$16 sps:$4 sm:$0xff]   ;;  %vm187_vm2 = vcmask 130048  }
  0x15   :  { %v54_v5 = vunpack.c.0.s8 %v53_v2  ;;  %v1349_v19 = vld [vmem:[#allocation2 + $0x4] ss:$8 sps:$4 sm:$0xff]   ;;  %v1344_v20 = vld [vmem:[%s1705_s2 + $0x8] ss:$16 sps:$4 sm:$0xff]   ;;  %v43_v22 = vld [vmem:[%s1703_s0] sm:$0xf] }
  0x16   :  { %v1352_v21 = vld [vmem:[#allocation2 + $0x104] ss:$8 sps:$4 sm:$0xff]   ;;  %v1347_v23 = vld [vmem:[#allocation2] ss:$8 sps:$4 sm:$0xff]   ;;  %v1355_v24 = vld [vmem:[#allocation2 + $0x14] ss:$8 sps:$4 sm:$0xff]  }
  0x17   :  { %v57_v6 = vsub.s32 %v54_v5, %v1556_v4  ;;  %v1350_v25 = vld [vmem:[#allocation2 + $0x100] ss:$8 sps:$4 sm:$0xff]   ;;  %v1358_v26 = vld [vmem:[#allocation2 + $0x114] ss:$8 sps:$4 sm:$0xff]   ;;  %v1353_v27 = vld [vmem:[#allocation2 + $0x10] ss:$8 sps:$4 sm:$0xff]  }
  0x18   :  { %v1361_v28 = vld [vmem:[#allocation2 + $0x24] ss:$8 sps:$4 sm:$0xff]   ;;  %v1356_v29 = vld [vmem:[#allocation2 + $0x110] ss:$8 sps:$4 sm:$0xff]   ;;  %v1359_v31 = vld [vmem:[#allocation2 + $0x20] ss:$8 sps:$4 sm:$0xff]  }
  0x19   :  { %v58_v8 = vrot.slane %v49_v7, %v57_v6  ;;  %v65_v12 = vrot.slane %v51_v9, %v57_v6  ;;  %v1364_v30 = vld [vmem:[#allocation2 + $0x124] ss:$8 sps:$4 sm:$0xff]   ;;  %v1367_v32 = vld [vmem:[#allocation2 + $0x34] ss:$8 sps:$4 sm:$0xff]   ;;  %v1362_v33 = vld [vmem:[#allocation2 + $0x120] ss:$8 sps:$4 sm:$0xff]  }
  0x1a   :  { %v1370_v34 = vld [vmem:[#allocation2 + $0x134] ss:$8 sps:$4 sm:$0xff]   ;;  %v1365_v35 = vld [vmem:[#allocation2 + $0x30] ss:$8 sps:$4 sm:$0xff]   ;;  %v1373_v36 = vld [vmem:[#allocation2 + $0x44] ss:$8 sps:$4 sm:$0xff]  }
  0x1b   :  { %v66_v10 = vcombine.high %v58_v8, %v58_v8  ;;  %v74_v11 = vsel %vm72_vm0, %v58_v8, 0  ;;  %v67_v15 = vcombine.high %v65_v12, %v65_v12  ;;  %v80_v16 = vsel %vm72_vm0, %v65_v12, 0  ;;  %v1368_v37 = vld [vmem:[#allocation2 + $0x130] ss:$8 sps:$4 sm:$0xff]   ;;  %v1376_v38 = vld [vmem:[#allocation2 + $0x144] ss:$8 sps:$4 sm:$0xff]  }
  0x1c   :  { %v1371_v39 = vld [vmem:[#allocation2 + $0x40] ss:$8 sps:$4 sm:$0xff]   ;;  %v1379_v40 = vld [vmem:[#allocation2 + $0x54] ss:$8 sps:$4 sm:$0xff]   ;;  %v1377_v42 = vld [vmem:[#allocation2 + $0x50] ss:$8 sps:$4 sm:$0xff]  }
  0x1d   :  { %1185 = vmatprep.subr.msk.bf16.mxu0 %vm72_vm0, %v66_v10  ;;  %1187 = vmatprep.subr.msk.bf16.mxu1 %vm72_vm0, %v67_v15  ;;  %v1374_v41 = vld [vmem:[#allocation2 + $0x140] ss:$8 sps:$4 sm:$0xff]   ;;  %v1382_v43 = vld [vmem:[#allocation2 + $0x154] ss:$8 sps:$4 sm:$0xff]   ;;  %v1380_v44 = vld [vmem:[#allocation2 + $0x150] ss:$8 sps:$4 sm:$0xff]  }
  0x1e   :  { %86 = vmatpush1.bf16.msra.mxu0 %v74_v11  ;;  %127 = vmatpush1.bf16.msra.mxu1 %v80_v16  ;;  %v1385_v45 = vld [vmem:[#allocation2 + $0x64] ss:$8 sps:$4 sm:$0xff]   ;;  %v1383_v47 = vld [vmem:[#allocation2 + $0x60] ss:$8 sps:$4 sm:$0xff]   ;;  %v1391_v48 = vld [vmem:[#allocation2 + $0x74] ss:$8 sps:$4 sm:$0xff]  }
  0x1f   :  { %191 = vmatprep.subr.bf16.mxu0 %v1343_v13  ;;  %232 = vmatprep.subr.bf16.mxu1 %v1346_v17  ;;  %v1388_v46 = vld [vmem:[#allocation2 + $0x164] ss:$8 sps:$4 sm:$0xff]   ;;  %v1386_v49 = vld [vmem:[#allocation2 + $0x160] ss:$8 sps:$4 sm:$0xff]   ;;  %v1394_v50 = vld [vmem:[#allocation2 + $0x174] ss:$8 sps:$4 sm:$0xff]  }
  0x20   :  { %v1389_v51 = vld [vmem:[#allocation2 + $0x70] ss:$8 sps:$4 sm:$0xff]   ;;  %v1397_v52 = vld [vmem:[#allocation2 + $0x84] ss:$8 sps:$4 sm:$0xff]   ;;  %v1395_v55 = vld [vmem:[#allocation2 + $0x80] ss:$8 sps:$4 sm:$0xff]  }
  0x21   :  { %1186 = vmatmul.mubr.msk.bf16.vlgmr.msra.gmra.mrb[0].mxu0 %vm68_vm1, %v48_v14  ;;  %1188 = vmatmul.mubr.msk.bf16.vlgmr.msra.gmra.mrb[0].mxu1 %vm68_vm1, %v48_v14  ;;  %v1392_v53 = vld [vmem:[#allocation2 + $0x170] ss:$8 sps:$4 sm:$0xff]   ;;  %v1400_v54 = vld [vmem:[#allocation2 + $0x184] ss:$8 sps:$4 sm:$0xff]   ;;  %v1403_v56 = vld [vmem:[#allocation2 + $0x94] ss:$8 sps:$4 sm:$0xff]  }
  0x22   :  { %192 = vmatpush1.bf16.msra.mxu0 %v1341_v18  ;;  %223 = vmatprep.mubr.bf16.mxu0 %v1503_v3  ;;  %v1398_v57 = vld [vmem:[#allocation2 + $0x180] ss:$8 sps:$4 sm:$0xff]   ;;  %v1406_v58 = vld [vmem:[#allocation2 + $0x194] ss:$8 sps:$4 sm:$0xff]   ;;  %v1401_v59 = vld [vmem:[#allocation2 + $0x90] ss:$8 sps:$4 sm:$0xff]  }
  0x23   :  { %515 = vmatprep.subr.bf16.mxu0 %v1349_v19  ;;  %233 = vmatpush1.bf16.msra.mxu1 %v1344_v20  ;;  %v1409_v60 = vld [vmem:[#allocation2 + $0xa4] ss:$8 sps:$4 sm:$0xff]   ;;  %v1404_v61 = vld [vmem:[#allocation2 + $0x190] ss:$8 sps:$4 sm:$0xff]   ;;  %v1407_v63 = vld [vmem:[#allocation2 + $0xa0] ss:$8 sps:$4 sm:$0xff]  }
  0x24   :  { %264 = vmatprep.mubr.bf16.mxu1 %v1503_v3  ;;  %749 = vmatprep.subr.bf16.mxu1 %v1352_v21  ;;  %v1412_v62 = vld [vmem:[#allocation2 + $0x1a4] ss:$8 sps:$4 sm:$0xff]   ;;  %v1415_v0 = vld [vmem:[#allocation2 + $0xb4] ss:$8 sps:$4 sm:$0xff]   ;;  %v1410_v1 = vld [vmem:[#allocation2 + $0x1a0] ss:$8 sps:$4 sm:$0xff]  }
  0x25   :  { %v1413_v2 = vld [vmem:[#allocation2 + $0xb0] ss:$8 sps:$4 sm:$0xff]   ;;  %v1418_v3 = vld [vmem:[#allocation2 + $0x1b4] ss:$8 sps:$4 sm:$0xff]   ;;  %v1421_v6 = vld [vmem:[#allocation2 + $0xc4] ss:$8 sps:$4 sm:$0xff]  }
  0x26   :  { %v1416_v5 = vld [vmem:[#allocation2 + $0x1b0] ss:$8 sps:$4 sm:$0xff]   ;;  %v1419_v7 = vld [vmem:[#allocation2 + $0xc0] ss:$8 sps:$4 sm:$0xff]   ;;  %v1424_v8 = vld [vmem:[#allocation2 + $0x1c4] ss:$8 sps:$4 sm:$0xff]  }
  0x27   :  { %v1422_v9 = vld [vmem:[#allocation2 + $0x1c0] ss:$8 sps:$4 sm:$0xff]   ;;  %v1425_v10 = vld [vmem:[#allocation2 + $0xd0] ss:$8 sps:$4 sm:$0xff]   ;;  %v1427_v11 = vld [vmem:[#allocation2 + $0xd4] ss:$8 sps:$4 sm:$0xff]  }
  0x28   :  { %v1430_v12 = vld [vmem:[#allocation2 + $0x1d4] ss:$8 sps:$4 sm:$0xff]   ;;  %v1428_v13 = vld [vmem:[#allocation2 + $0x1d0] ss:$8 sps:$4 sm:$0xff]   ;;  %v1433_v14 = vld [vmem:[#allocation2 + $0xe4] ss:$8 sps:$4 sm:$0xff]  }
  0x29   :  { %1193 = vmatmul.mubr.msk.bf16.vlgmr.msra.gmra.mrb[4].mxu0 %vm187_vm2, %v43_v22  ;;  %1194 = vmatmul.mubr.msk.bf16.vlgmr.msra.gmra.mrb[4].mxu1 %vm187_vm2, %v43_v22  ;;  %v1431_v15 = vld [vmem:[#allocation2 + $0xe0] ss:$8 sps:$4 sm:$0xff]   ;;  %v1436_v16 = vld [vmem:[#allocation2 + $0x1e4] ss:$8 sps:$4 sm:$0xff]   ;;  %v1439_v18 = vld [vmem:[#allocation2 + $0xf4] ss:$8 sps:$4 sm:$0xff]  }
  0x2a   :  { %516 = vmatpush1.bf16.msra.mxu0 %v1347_v23  ;;  %750 = vmatpush1.bf16.msra.mxu1 %v1350_v25  ;;  %v1434_v17 = vld [vmem:[#allocation2 + $0x1e0] ss:$8 sps:$4 sm:$0xff]   ;;  %v1437_v19 = vld [vmem:[#allocation2 + $0xf0] ss:$8 sps:$4 sm:$0xff]   ;;  %v1442_v20 = vld [vmem:[#allocation2 + $0x1f4] ss:$8 sps:$4 sm:$0xff]  }
  0x2b   :  { %517 = vmatprep.subr.bf16.mxu0 %v1355_v24  ;;  %751 = vmatprep.subr.bf16.mxu1 %v1358_v26  ;;  %v1440_v21 = vld [vmem:[#allocation2 + $0x1f0] ss:$8 sps:$4 sm:$0xff]   ;;  %v1443_v22 = vld [vmem:[%s1708_s5 + $0x40] sm:$0xff]   ;;  %v277_v24 = vsub.s32 0, %v1556_v4  ;;  %vm1178_vm3 = vcmask 15360  }
  0x2c   :  { %v1445_v23 = vld [vmem:[%s1708_s5 + $0xc0] sm:$0xff]  }
  0x2d   :  { %v1590_v26 = vld [vmem:[%s1709_s6] sm:$0x77] }
  0x2e   :  { %518 = vmatpush1.bf16.msra.mxu0 %v1353_v27  ;;  %752 = vmatpush1.bf16.msra.mxu1 %v1356_v29  ;;  %v281_v27 = vsub.s32 4, %v1556_v4 }
  0x2f   :  { %519 = vmatprep.subr.bf16.mxu0 %v1361_v28  ;;  %753 = vmatprep.subr.bf16.mxu1 %v1364_v30 }
  0x32   :  { %520 = vmatpush1.bf16.msra.mxu0 %v1359_v31  ;;  %754 = vmatpush1.bf16.msra.mxu1 %v1362_v33  ;;  %v1596_v31 = vld [vmem:[%s1709_s6 + $0x8] sm:$0x77] }
  0x33   :  { %521 = vmatprep.subr.bf16.mxu0 %v1367_v32  ;;  %755 = vmatprep.subr.bf16.mxu1 %v1370_v34  ;;  %v278_v34 = vrot.slane %v1590_v26, %v277_v24 }
  0x36   :  { %522 = vmatpush1.bf16.msra.mxu0 %v1365_v35  ;;  %756 = vmatpush1.bf16.msra.mxu1 %v1368_v37 }
  0x37   :  { %523 = vmatprep.subr.bf16.mxu0 %v1373_v36  ;;  %757 = vmatprep.subr.bf16.mxu1 %v1376_v38  ;;  %v282_v36 = vrot.slane %v1590_v26, %v281_v27  ;;  %v286_v38 = vrot.slane %v1596_v31, %v277_v24 }
  0x3a   :  { %524 = vmatpush1.bf16.msra.mxu0 %v1371_v39  ;;  %758 = vmatpush1.bf16.msra.mxu1 %v1374_v41  ;;  %v290_v39 = vrot.slane %v1596_v31, %v281_v27  ;;  %v1466_v27 = vld [vmem:[%s1708_s5 + $0xa8] sm:$0xff]  }
  0x3b   :  { %525 = vmatprep.subr.bf16.mxu0 %v1379_v40  ;;  %759 = vmatprep.subr.bf16.mxu1 %v1382_v43  ;;  %v298_v40 = vrot.slane %v278_v34, %v277_v24  ;;  %v1472_v34 = vld [vmem:[%s1708_s5 + $0x38] sm:$0xff]  }
  0x3e   :  { %526 = vmatpush1.bf16.msra.mxu0 %v1377_v42  ;;  %760 = vmatpush1.bf16.msra.mxu1 %v1380_v44  ;;  %v302_v42 = vrot.slane %v282_v36, %v277_v24  ;;  %v1474_v36 = vld [vmem:[%s1708_s5 + $0xb8] sm:$0xff]  }
  0x3f   :  { %527 = vmatprep.subr.bf16.mxu0 %v1385_v45  ;;  %761 = vmatprep.subr.bf16.mxu1 %v1388_v46  ;;  %v306_v45 = vrot.slane %v286_v38, %v277_v24  ;;  %v796_v38 = vsub.s32 5, %v1556_v4 }
  0x42   :  { %528 = vmatpush1.bf16.msra.mxu0 %v1383_v47  ;;  %762 = vmatpush1.bf16.msra.mxu1 %v1386_v49  ;;  %v310_v49 = vrot.slane %v290_v39, %v277_v24  ;;  %v1465_v24 = vld [vmem:[%s1708_s5 + $0xe8] sm:$0xff]  }
  0x43   :  { %529 = vmatprep.subr.bf16.mxu0 %v1391_v48  ;;  %763 = vmatprep.subr.bf16.mxu1 %v1394_v50 }
  0x46   :  { %530 = vmatpush1.bf16.msra.mxu0 %v1389_v51  ;;  %764 = vmatpush1.bf16.msra.mxu1 %v1392_v53 }
  0x47   :  { %531 = vmatprep.subr.bf16.mxu0 %v1397_v52  ;;  %765 = vmatprep.subr.bf16.mxu1 %v1400_v54 }
  0x4a   :  { %532 = vmatpush1.bf16.msra.mxu0 %v1395_v55  ;;  %766 = vmatpush1.bf16.msra.mxu1 %v1398_v57 }
  0x4b   :  { %533 = vmatprep.subr.bf16.mxu0 %v1403_v56  ;;  %767 = vmatprep.subr.bf16.mxu1 %v1406_v58 }
  0x4e   :  { %534 = vmatpush1.bf16.msra.mxu0 %v1401_v59  ;;  %768 = vmatpush1.bf16.msra.mxu1 %v1404_v61 }
  0x4f   :  { %535 = vmatprep.subr.bf16.mxu0 %v1409_v60  ;;  %769 = vmatprep.subr.bf16.mxu1 %v1412_v62 }
  0x52   :  { %536 = vmatpush1.bf16.msra.mxu0 %v1407_v63  ;;  %770 = vmatpush1.bf16.msra.mxu1 %v1410_v1  ;;  %v1444_v1 = vld [vmem:[%s1708_s5] sm:$0xff]  }
  0x53   :  { %537 = vmatprep.subr.bf16.mxu0 %v1415_v0  ;;  %771 = vmatprep.subr.bf16.mxu1 %v1418_v3  ;;  %v1447_v3 = vld [vmem:[%s1708_s5 + $0x48] sm:$0xff]  }
  0x56   :  { %538 = vmatpush1.bf16.msra.mxu0 %v1413_v2  ;;  %772 = vmatpush1.bf16.msra.mxu1 %v1416_v5 }
  0x57   :  { %539 = vmatprep.subr.bf16.mxu0 %v1421_v6  ;;  %773 = vmatprep.subr.bf16.mxu1 %v1424_v8  ;;  %v1446_v6 = vld [vmem:[%s1708_s5 + $0x80] sm:$0xff]   ;;  %v1449_v8 = vld [vmem:[%s1708_s5 + $0xc8] sm:$0xff]  }
  0x5a   :  { %540 = vmatpush1.bf16.msra.mxu0 %v1419_v7  ;;  %774 = vmatpush1.bf16.msra.mxu1 %v1422_v9  ;;  %v1448_v9 = vld [vmem:[%s1708_s5 + $0x8] sm:$0xff]  }
  0x5b   :  { %541 = vmatprep.subr.bf16.mxu0 %v1427_v11  ;;  %775 = vmatprep.subr.bf16.mxu1 %v1430_v12  ;;  %v1450_v11 = vld [vmem:[%s1708_s5 + $0x88] sm:$0xff]   ;;  %v1453_v12 = vld [vmem:[%s1708_s5 + $0xd0] sm:$0xff]  }
  0x5e   :  { %542 = vmatpush1.bf16.msra.mxu0 %v1425_v10  ;;  %776 = vmatpush1.bf16.msra.mxu1 %v1428_v13  ;;  %v1451_v10 = vld [vmem:[%s1708_s5 + $0x50] sm:$0xff]  }
  0x5f   :  { %543 = vmatprep.subr.bf16.mxu0 %v1433_v14  ;;  %777 = vmatprep.subr.bf16.mxu1 %v1436_v16  ;;  %v1452_v13 = vld [vmem:[%s1708_s5 + $0x10] sm:$0xff]   ;;  %v1455_v14 = vld [vmem:[%s1708_s5 + $0x58] sm:$0xff]  }
  0x60   :  { %v1457_v16 = vld [vmem:[%s1708_s5 + $0xd8] sm:$0xff]  }
  0x62   :  { %544 = vmatpush1.bf16.msra.mxu0 %v1431_v15  ;;  %778 = vmatpush1.bf16.msra.mxu1 %v1434_v17  ;;  %v1454_v15 = vld [vmem:[%s1708_s5 + $0x90] sm:$0xff]   ;;  %v1456_v17 = vld [vmem:[%s1708_s5 + $0x18] sm:$0xff]  }
  0x63   :  { %545 = vmatprep.subr.bf16.mxu0 %v1439_v18  ;;  %779 = vmatprep.subr.bf16.mxu1 %v1442_v20  ;;  %v1459_v18 = vld [vmem:[%s1708_s5 + $0x60] sm:$0xff]  }
  0x64   :  { %v1461_v20 = vld [vmem:[%s1708_s5 + $0xe0] sm:$0xff]  }
  0x66   :  { %546 = vmatpush1.bf16.msra.mxu0 %v1437_v19  ;;  %780 = vmatpush1.bf16.msra.mxu1 %v1440_v21  ;;  %v1458_v19 = vld [vmem:[%s1708_s5 + $0x98] sm:$0xff]   ;;  %v1460_v21 = vld [vmem:[%s1708_s5 + $0x20] sm:$0xff]  }
  0x67   :  { %1291 = vmatprep.subr.bf16.mxu0 %v1443_v22  ;;  %1313 = vmatprep.subr.bf16.mxu1 %v1445_v23  ;;  %v1463_v22 = vld [vmem:[%s1708_s5 + $0x68] sm:$0xff]   ;;  %v1462_v23 = vld [vmem:[%s1708_s5 + $0xa0] sm:$0xff]  }
  0xf4   :  { %v119_v25 = vpop.f32.mrb[0].mxu0  ;;  %v160_v30 = vpop.f32.mrb[0].mxu1 }
  0xf5   :  { %v121_v28 = vpop.f32.mrb[1].mxu0  ;;  %v162_v33 = vpop.f32.mrb[1].mxu1 }
  0xf6   :  { %v123_v29 = vpop.f32.mrb[2].mxu0  ;;  %v164_v35 = vpop.f32.mrb[2].mxu1 }
  0xf7   :  { %v124_v32 = vpop.f32.mrb[3].mxu0  ;;  %v165_v37 = vpop.f32.mrb[3].mxu1  ;;  %v1468_v29 = vld [vmem:[%s1708_s5 + $0x30] sm:$0xff]   ;;  %v1473_v35 = vld [vmem:[%s1708_s5 + $0xf8] sm:$0xff]  }
  0xf8   :  { %v1470_v32 = vld [vmem:[%s1708_s5 + $0xb0] sm:$0xff]   ;;  %v792_v37 = vsub.s32 1, %v1556_v4 }
  0xfa   :  { %v793_v39 = vrot.slane %v1590_v26, %v792_v37 }
  0xfc   :  { %v225_v41 = vpop.f32.mrb[4].mxu0  ;;  %v266_v48 = vpop.f32.mrb[4].mxu1 }
  0xfd   :  { %v226_v43 = vadd.f32 %v225_v41, %v119_v25  ;;  %v227_v44 = vpop.f32.mrb[5].mxu0  ;;  %v267_v51 = vadd.f32 %v266_v48, %v160_v30  ;;  %v268_v53 = vpop.f32.mrb[5].mxu1  ;;  %v1464_v25 = vld [vmem:[%s1708_s5 + $0x28] sm:$0xff]   ;;  %v1469_v30 = vld [vmem:[%s1708_s5 + $0xf0] sm:$0xff]   ;;  %v801_v41 = vrot.slane %v1596_v31, %v792_v37 }
  0xfe   :  { %v228_v46 = vadd.f32 %v227_v44, %v121_v28  ;;  %v229_v47 = vpop.f32.mrb[6].mxu0  ;;  %v269_v55 = vadd.f32 %v268_v53, %v162_v33  ;;  %v270_v56 = vpop.f32.mrb[6].mxu1  ;;  %v1467_v28 = vld [vmem:[%s1708_s5 + $0x70] sm:$0xff]   ;;  %v1471_v33 = vld [vmem:[%s1708_s5 + $0x78] sm:$0xff]  }
  0xff   :  { %v311_v50 = vadd.f32 %v298_v40, %v226_v43  ;;  %v230_v52 = vpop.f32.mrb[7].mxu0  ;;  %v313_v58 = vadd.f32 %v306_v45, %v267_v51  ;;  %v271_v59 = vpop.f32.mrb[7].mxu1  ;;  %v797_v40 = vrot.slane %v1590_v26, %v796_v38  ;;  %v813_v43 = vrot.slane %v793_v39, %v792_v37 }
 0x100   :  { %v312_v54 = vadd.f32 %v302_v42, %v228_v46  ;;  %v314_v61 = vadd.f32 %v310_v49, %v269_v55  ;;  %v805_v42 = vrot.slane %v1596_v31, %v796_v38  ;;  %v821_v45 = vrot.slane %v801_v41, %v792_v37 }
 0x101   :  { %v315_v57 = vmax.f32 %v311_v50, 0.0  ;;  %v317_v62 = vmax.f32 %v313_v58, 0.0  ;;  %v817_v44 = vrot.slane %v797_v40, %v792_v37 }
 0x102   :  { %v316_v60 = vmax.f32 %v312_v54, 0.0  ;;  %v318_v0 = vmax.f32 %v314_v61, 0.0  ;;  %v825_v47 = vrot.slane %v805_v42, %v792_v37 }
 0x103   :  { %v319_v2 = vpack.c.bf16 %v315_v57, %v315_v57  ;;  %v321_v7 = vpack.c.bf16 %v317_v62, %v317_v62 }
 0x104   :  { %v320_v63 = vpack.c.bf16 %v316_v60, %v316_v60  ;;  %v322_v5 = vpack.c.bf16 %v318_v0, %v318_v0 }
 0x106   :  { %547 = vmatprep.mubr.bf16.mxu0 %v320_v63  ;;  %781 = vmatprep.mubr.bf16.mxu1 %v322_v5 }
 0x107   :  { %548 = vmatmul.mubr.bf16.vlgmr.msra.gmra.mrb[8].mxu0 %v319_v2  ;;  %782 = vmatmul.mubr.bf16.vlgmr.msra.gmra.mrb[8].mxu1 %v321_v7  ;;  %v904_v2 = vsub.s32 2, %v1556_v4 }
 0x108   :  { %1292 = vmatpush3.bf16.msra.mxu0 %v1444_v1  ;;  %1314 = vmatpush3.bf16.msra.mxu1 %v1446_v6 }
 0x109   :  { %1293 = vmatprep.subr.bf16.mxu0 %v1447_v3  ;;  %1315 = vmatprep.subr.bf16.mxu1 %v1449_v8  ;;  %v905_v5 = vrot.slane %v1590_v26, %v904_v2 }
 0x10c   :  { %1294 = vmatpush3.bf16.msra.mxu0 %v1448_v9  ;;  %1316 = vmatpush3.bf16.msra.mxu1 %v1450_v11 }
 0x10d   :  { %1295 = vmatprep.subr.bf16.mxu0 %v1451_v10  ;;  %1317 = vmatprep.subr.bf16.mxu1 %v1453_v12 }
 0x110   :  { %1296 = vmatpush3.bf16.msra.mxu0 %v1452_v13  ;;  %1318 = vmatpush3.bf16.msra.mxu1 %v1454_v15 }
 0x111   :  { %1297 = vmatprep.subr.bf16.mxu0 %v1455_v14  ;;  %1319 = vmatprep.subr.bf16.mxu1 %v1457_v16 }
 0x114   :  { %1298 = vmatpush3.bf16.msra.mxu0 %v1456_v17  ;;  %1320 = vmatpush3.bf16.msra.mxu1 %v1458_v19 }
 0x115   :  { %1299 = vmatprep.subr.bf16.mxu0 %v1459_v18  ;;  %1321 = vmatprep.subr.bf16.mxu1 %v1461_v20 }
 0x118   :  { %1300 = vmatpush3.bf16.msra.mxu0 %v1460_v21  ;;  %1322 = vmatpush3.bf16.msra.mxu1 %v1462_v23 }
 0x119   :  { %1301 = vmatprep.subr.bf16.mxu0 %v1463_v22  ;;  %1323 = vmatprep.subr.bf16.mxu1 %v1465_v24 }
 0x11c   :  { %1302 = vmatpush3.bf16.msra.mxu0 %v1464_v25  ;;  %1324 = vmatpush3.bf16.msra.mxu1 %v1466_v27 }
 0x11d   :  { %1303 = vmatprep.subr.bf16.mxu0 %v1467_v28  ;;  %1325 = vmatprep.subr.bf16.mxu1 %v1469_v30 }
 0x120   :  { %1304 = vmatpush3.bf16.msra.mxu0 %v1468_v29  ;;  %1326 = vmatpush3.bf16.msra.mxu1 %v1470_v32 }
 0x121   :  { %1305 = vmatprep.subr.bf16.mxu0 %v1471_v33  ;;  %1327 = vmatprep.subr.bf16.mxu1 %v1473_v35 }
 0x124   :  { %1306 = vmatpush3.bf16.msra.mxu0 %v1472_v34  ;;  %1328 = vmatpush3.bf16.msra.mxu1 %v1474_v36 }
 0x1da   :  { %v549_v46 = vpop.f32.mrb[8].mxu0  ;;  %v783_v52 = vpop.f32.mrb[8].mxu1 }
 0x1db   :  { %v826_v48 = vadd.f32 %v813_v43, %v549_v46  ;;  %v551_v49 = vpop.f32.mrb[9].mxu0  ;;  %v828_v54 = vadd.f32 %v821_v45, %v783_v52  ;;  %v785_v56 = vpop.f32.mrb[9].mxu1 }
 0x1dc   :  { %v827_v50 = vadd.f32 %v817_v44, %v551_v49  ;;  %v553_v51 = vpop.f32.mrb[10].mxu0  ;;  %v829_v58 = vadd.f32 %v825_v47, %v785_v56  ;;  %v787_v59 = vpop.f32.mrb[10].mxu1 }
 0x1dd   :  { %v830_v53 = vmax.f32 %v826_v48, 0.0  ;;  %v554_v55 = vpop.f32.mrb[11].mxu0  ;;  %v832_v60 = vmax.f32 %v828_v54, 0.0  ;;  %v788_v61 = vpop.f32.mrb[11].mxu1 }
 0x1de   :  { %v831_v57 = vmax.f32 %v827_v50, 0.0  ;;  %v833_v62 = vmax.f32 %v829_v58, 0.0 }
 0x1df   :  { %v834_v63 = vpack.c.bf16 %v830_v53, %v830_v53  ;;  %v836_v1 = vpack.c.bf16 %v832_v60, %v832_v60 }
 0x1e0   :  { %v835_v31 = vpack.c.bf16 %v831_v57, %v831_v57  ;;  %v837_v0 = vpack.c.bf16 %v833_v62, %v833_v62 }
 0x1e2   :  { %1130 = vmatprep.mubr.bf16.mxu0 %v835_v31  ;;  %1170 = vmatprep.mubr.bf16.mxu1 %v837_v0 }
 0x1e3   :  { %1131 = vmatmul.mubr.bf16.vlgmr.msra.gmra.mrb[12].mxu0 %v834_v63  ;;  %1171 = vmatmul.mubr.bf16.vlgmr.msra.gmra.mrb[12].mxu1 %v836_v1 }
 0x2b6   :  { %v1307_v3 = vpop.f32.mrb[12].mxu0  ;;  %v1329_v9 = vpop.f32.mrb[12].mxu1 }
 0x2b7   :  { %v1308_v6 = vpop.f32.mrb[13].mxu0  ;;  %v1330_v11 = vpop.f32.mrb[13].mxu1 }
 0x2b8   :  { %v1309_v7 = vadd.f32 %v1308_v6, %v1307_v3  ;;  %v1310_v8 = vpop.f32.mrb[14].mxu0  ;;  %v1331_v13 = vadd.f32 %v1330_v11, %v1329_v9  ;;  %v1332_v14 = vpop.f32.mrb[14].mxu1 }
 0x2b9   :  { %v1311_v10 = vpop.f32.mrb[15].mxu0  ;;  %v1333_v15 = vpop.f32.mrb[15].mxu1 }
 0x2ba   :  { %v1133_v12 = vadd.f32 %v1309_v7, %v905_v5 }
 0x2bc   :  { %v1173_v16 = vadd.f32 %v1331_v13, %v1133_v12 }
 0x2be   :  { %1179 = vst.msk [vmem:[%s1710_s7] sm:$0xff] %vm1178_vm3, %v1173_v16 }
 0x2bf   :  { %1184 = vsyncpa [#allocation3], 1 }

</bundles_post_ra>
